<compile_context>
chip_gen: v6e
topology: v6e:2x2x1
jax: 0.10.0
libtpu: 0.0.40
codegen_flags: <defaults>
</compile_context>

<pallas_src>
import functools

import jax
import jax.numpy as jnp
from jax.experimental import pallas as pl
from jax.experimental.pallas import tpu as pltpu

_LANE = 128
_SUBLANE = 8


def _round_up(x, m):
    return (x + m - 1) // m * m


def _pick_tiles(n, tm_target=256, tk_target=512):
    """Row/contraction tile sizes. Both are multiples of 128 and divide n_pad."""
    n128 = _round_up(n, _LANE)
    tm = min(tm_target, n128)
    tk = min(tk_target, n128)
    n_pad = _round_up(n, max(tm, tk))
    return tm, tk, n_pad


def _vmem_limit_bytes():
    """Per-generation VMEM cap: ~half of physical VMEM, capped at 64 MiB."""
    try:
        cap = int(pltpu.get_tpu_info().vmem_capacity_bytes)
        return max(16 * 1024 * 1024, min(cap // 2, 64 * 1024 * 1024))
    except Exception:
        return 48 * 1024 * 1024


def _sage_layer_kernel(a_ref, x_ref, xs_ref, inv_deg_ref, wl_ref, wr_ref, b_ref,
                       o_ref, acc_ref, *, relu):
    """One SAGEConv layer, (row tile TM) x (neighbor tile TK) grid step.

    a_ref       : (TM, TK)        bf16  adjacency (exact edge counts) tile
    x_ref       : (TK, F_pad)     bf16  neighbor-feature K-slab
    xs_ref      : (TM, F_pad)     bf16  "self" features of this row tile
    inv_deg_ref : (TM, 1)         f32   1 / max(in-degree, 1)
    wl_ref      : (F_pad, C_pad)  bf16  neighbor weight
    wr_ref      : (F_pad, C_pad)  bf16  root weight
    b_ref       : (1, C_pad)      f32   bias
    o_ref       : (TM, C_pad)           output tile
    acc_ref     : (TM, F_pad)     f32   aggregation accumulator (VMEM scratch)
    """
    k = pl.program_id(1)

    @pl.when(k == 0)
    def _():
        acc_ref[...] = jnp.zeros_like(acc_ref)

    # Neighbor-sum over this K slab: bf16 x bf16 on the MXU, f32 accumulation.
    acc_ref[...] += jnp.dot(a_ref[...], x_ref[...],
                            preferred_element_type=jnp.float32)

    @pl.when(k == pl.num_programs(1) - 1)
    def _():
        # Mean aggregation: counts were accumulated exactly; apply f32 1/deg now.
        agg = (acc_ref[...] * inv_deg_ref[...]).astype(jnp.bfloat16)
        out = jnp.dot(agg, wl_ref[...], preferred_element_type=jnp.float32)
        out = out + jnp.dot(xs_ref[...], wr_ref[...],
                            preferred_element_type=jnp.float32)
        out = out + b_ref[...]
        if relu:
            out = jnp.maximum(out, 0.0)
        o_ref[...] = out.astype(o_ref.dtype)


def _sage_layer(a_cnt, x_pad, x_self, inv_deg, w_l, w_r, b_row, *,
                relu, out_dtype, tm, tk):
    n_pad = a_cnt.shape[0]
    f_pad = x_pad.shape[1]
    c_pad = w_l.shape[1]

    flops = 2 * n_pad * n_pad * f_pad + 2 * 2 * n_pad * f_pad * c_pad
    bytes_accessed = (a_cnt.size * 2 + x_pad.size * 2 + x_self.size * 2
                      + inv_deg.size * 4 + (w_l.size + w_r.size) * 2
                      + b_row.size * 4
                      + n_pad * c_pad * jnp.dtype(out_dtype).itemsize)

    return pl.pallas_call(
        functools.partial(_sage_layer_kernel, relu=relu),
        out_shape=jax.ShapeDtypeStruct((n_pad, c_pad), out_dtype),
        grid=(n_pad // tm, n_pad // tk),
        in_specs=[
            pl.BlockSpec((tm, tk), lambda i, k: (i, k)),         # A tile (streamed)
            pl.BlockSpec((tk, f_pad), lambda i, k: (k, 0)),      # neighbor features slab
            pl.BlockSpec((tm, f_pad), lambda i, k: (i, 0)),      # self features (row tile)
            pl.BlockSpec((tm, 1), lambda i, k: (i, 0)),          # inverse degree (row tile)
            pl.BlockSpec((f_pad, c_pad), lambda i, k: (0, 0)),   # W_neigh (resident)
            pl.BlockSpec((f_pad, c_pad), lambda i, k: (0, 0)),   # W_root  (resident)
            pl.BlockSpec((1, c_pad), lambda i, k: (0, 0)),       # bias    (resident)
        ],
        out_specs=pl.BlockSpec((tm, c_pad), lambda i, k: (i, 0)),
        scratch_shapes=[pltpu.VMEM((tm, f_pad), jnp.float32)],
        compiler_params=pltpu.CompilerParams(
            dimension_semantics=("parallel", "arbitrary"),
            vmem_limit_bytes=_vmem_limit_bytes(),
        ),
        cost_estimate=pl.CostEstimate(flops=flops, transcendentals=0,
                                      bytes_accessed=bytes_accessed),
    )(a_cnt, x_pad, x_self, inv_deg, w_l, w_r, b_row)


def sage_encoder_pallas(x, edge_index, params, *, tm_target=256, tk_target=512):
    """Two-layer GraphSAGE encoder (mean aggregation) on TPU via Pallas."""
    N, f_in = x.shape
    wl1, wr1, b1 = params["wl1"], params["wr1"], params["b1"]
    wl2, wr2, b2 = params["wl2"], params["wr2"], params["b2"]
    hidden = wl1.shape[1]
    out_ch = wl2.shape[1]

    # ---- glue: dense edge-count adjacency + f32 inverse degree ----------------
    # TODO(synk): for large sparse graphs, replace this dense (N, N) adjacency
    # (O(N^2) HBM traffic per layer) with a scalar-prefetch CSR/gather
    # formulation (PrefetchScalarGridSpec + per-tile neighbor offsets or
    # segment-sum over gathered rows) so traffic scales with E instead of N^2.
    src, dst = edge_index[0], edge_index[1]
    adj = jnp.zeros((N, N), jnp.float32).at[dst, src].add(1.0)    # edge counts
    deg = adj.sum(axis=1, keepdims=True)
    inv_deg = 1.0 / jnp.maximum(deg, 1.0)                         # f32, exact path

    # ---- padding: node rows to the tile sizes, channel dims to 128 lanes ------
    tm, tk, n_pad = _pick_tiles(N, tm_target, tk_target)
    f_pad = _round_up(f_in, _LANE)
    h_pad = _round_up(hidden, _LANE)
    o_pad = _round_up(out_ch, _LANE)

    a_p = jnp.zeros((n_pad, n_pad), jnp.bfloat16).at[:N, :N].set(
        adj.astype(jnp.bfloat16))                 # small-int counts: exact in bf16
    x_p = jnp.zeros((n_pad, f_pad), jnp.bfloat16).at[:N, :f_in].set(
        x.astype(jnp.bfloat16))
    d_p = jnp.ones((n_pad, 1), jnp.float32).at[:N, :].set(inv_deg)

    wl1_p = jnp.zeros((f_pad, h_pad), jnp.bfloat16).at[:f_in, :hidden].set(
        wl1.astype(jnp.bfloat16))
    wr1_p = jnp.zeros((f_pad, h_pad), jnp.bfloat16).at[:f_in, :hidden].set(
        wr1.astype(jnp.bfloat16))
    b1_p = jnp.zeros((1, h_pad), jnp.float32).at[0, :hidden].set(b1)

    wl2_p = jnp.zeros((h_pad, o_pad), jnp.bfloat16).at[:hidden, :out_ch].set(
        wl2.astype(jnp.bfloat16))
    wr2_p = jnp.zeros((h_pad, o_pad), jnp.bfloat16).at[:hidden, :out_ch].set(
        wr2.astype(jnp.bfloat16))
    b2_p = jnp.zeros((1, o_pad), jnp.float32).at[0, :out_ch].set(b2)

    # ---- layer 1: SAGEConv + ReLU (bf16 output feeds layer 2's aggregation) ---
    h_p = _sage_layer(a_p, x_p, x_p, d_p, wl1_p, wr1_p, b1_p,
                      relu=True, out_dtype=jnp.bfloat16, tm=tm, tk=tk)
    # ---- layer 2: SAGEConv -----------------------------------------------------
    out_p = _sage_layer(a_p, h_p, h_p, d_p, wl2_p, wr2_p, b2_p,
                        relu=False, out_dtype=jnp.float32, tm=tm, tk=tk)

    return out_p[:N, :out_ch]


def sage_encoder_ref(x, edge_index, params):
    """Pure-JAX f32 reference matching PyG SAGEConv semantics."""
    N = x.shape[0]
    src, dst = edge_index[0], edge_index[1]
    adj = jnp.zeros((N, N), jnp.float32).at[dst, src].add(1.0)
    deg = adj.sum(axis=1, keepdims=True)
    a = adj / jnp.maximum(deg, 1.0)

    h = a @ x @ params["wl1"] + x @ params["wr1"] + params["b1"]
    h = jnp.maximum(h, 0.0)
    return a @ h @ params["wl2"] + h @ params["wr2"] + params["b2"]


def init_params(key, f_in, hidden, out):
    ks = jax.random.split(key, 4)
    s1 = 1.0 / jnp.sqrt(jnp.float32(f_in))
    s2 = 1.0 / jnp.sqrt(jnp.float32(hidden))
    return {
        "wl1": jax.random.uniform(ks[0], (f_in, hidden), jnp.float32, -s1, s1),
        "wr1": jax.random.uniform(ks[1], (f_in, hidden), jnp.float32, -s1, s1),
        "b1": jnp.zeros((hidden,), jnp.float32),
        "wl2": jax.random.uniform(ks[2], (hidden, out), jnp.float32, -s2, s2),
        "wr2": jax.random.uniform(ks[3], (hidden, out), jnp.float32, -s2, s2),
        "b2": jnp.zeros((out,), jnp.float32),
    }


if __name__ == "__main__":
    key = jax.random.PRNGKey(0)
    k_x, k_e, k_p = jax.random.split(key, 3)

    N, F_IN, HIDDEN, OUT, E = 16, 8, 32, 16, 48

    x = jax.random.normal(k_x, (N, F_IN), jnp.float32)
    edge_index = jax.random.randint(k_e, (2, E), 0, N, jnp.int32)
    params = init_params(k_p, F_IN, HIDDEN, OUT)

    fwd = jax.jit(sage_encoder_pallas)
    out = fwd(x, edge_index, params)
    out = jax.block_until_ready(out)

    ref = sage_encoder_ref(x, edge_index, params)
    assert out.shape == (N, OUT)
    # bf16 feature/weight operands with exact bf16 adjacency counts, f32 inverse
    # degree and f32 accumulation -> tolerance tightened vs. the previous 5e-2.
    err = float(jnp.max(jnp.abs(out - ref)))
    assert jnp.allclose(out, ref, atol=3e-2, rtol=3e-2), f"max abs err = {err}"

    print("KERNEL_OK")
</pallas_src>

<mosaic_0001>
module attributes {stable_mosaic.version = 11 : i64} {
  func.func private @main(%arg0: i32) attributes {dimension_semantics = [#tpu.dimension_semantics<core_parallel>], iteration_bounds = array<i64: 2>, tpu.core_type = #tpu.core_type<sc_scalar_subcore>, window_params = []} {
    return
  }
}

module attributes {stable_mosaic.version = 11 : i64} {
  func.func private @main(%arg0: i32) attributes {dimension_semantics = [#tpu.dimension_semantics<core_parallel>], iteration_bounds = array<i64: 2>, tpu.core_type = #tpu.core_type<sc_scalar_subcore>, window_params = []} {
    return
  }
}

module attributes {stable_mosaic.version = 11 : i64} {
  func.func @_sage_layer_kernel(%arg0: i32, %arg1: i32, %arg2: memref<128x128xbf16, #tpu.memory_space<vmem>>, %arg3: memref<128x128xbf16, #tpu.memory_space<vmem>>, %arg4: memref<128x128xbf16, #tpu.memory_space<vmem>>, %arg5: memref<128x1xf32, #tpu.memory_space<vmem>>, %arg6: memref<128x128xbf16, #tpu.memory_space<vmem>>, %arg7: memref<128x128xbf16, #tpu.memory_space<vmem>>, %arg8: memref<1x128xf32, #tpu.memory_space<vmem>>, %arg9: memref<128x128xbf16, #tpu.memory_space<vmem>>, %arg10: memref<128x128xf32, #tpu.memory_space<vmem>>) attributes {dimension_semantics = [#tpu.dimension_semantics<parallel>, #tpu.dimension_semantics<arbitrary>], iteration_bounds = array<i64: 1, 1>, scalar_prefetch = 0 : i64, scratch_operands = 1 : i64, tpu.core_type = #tpu.core_type<tc>, window_params = [{transform_indices = @transform_0, window_bounds = array<i64: 128, 128>}, {transform_indices = @transform_1, window_bounds = array<i64: 128, 128>}, {transform_indices = @transform_2, window_bounds = array<i64: 128, 128>}, {transform_indices = @transform_3, window_bounds = array<i64: 128, 1>}, {pipeline_mode = #tpu.pipeline_mode<synchronous>, transform_indices = @transform_4, window_bounds = array<i64: 128, 128>}, {pipeline_mode = #tpu.pipeline_mode<synchronous>, transform_indices = @transform_5, window_bounds = array<i64: 128, 128>}, {pipeline_mode = #tpu.pipeline_mode<synchronous>, transform_indices = @transform_6, window_bounds = array<i64: 1, 128>}, {transform_indices = @transform_7, window_bounds = array<i64: 128, 128>}]} {
    %c0_i32 = arith.constant 0 : i32
    %0 = arith.cmpi eq, %arg1, %c0_i32 : i32
    %1 = arith.extui %0 : i1 to i32
    %c0_i32_0 = arith.constant 0 : i32
    %2 = arith.cmpi ne, %1, %c0_i32_0 : i32
    scf.if %2 {
      %cst_10 = arith.constant 0.000000e+00 : f32
      %12 = vector.broadcast %cst_10 : f32 to vector<128x128xf32>
      %c0_11 = arith.constant 0 : index
      %c0_12 = arith.constant 0 : index
      %13 = vector.load %arg10[%c0_11, %c0_12] : memref<128x128xf32, #tpu.memory_space<vmem>>, vector<128x128xf32>
      tpu.vector_store %arg10[%c0_11, %c0_12], %12 {strides = array<i32>} : memref<128x128xf32, #tpu.memory_space<vmem>>, vector<128x128xf32>,
    } else {
    }
    %c0 = arith.constant 0 : index
    %c0_1 = arith.constant 0 : index
    %3 = vector.load %arg10[%c0, %c0_1] : memref<128x128xf32, #tpu.memory_space<vmem>>, vector<128x128xf32>
    %c0_2 = arith.constant 0 : index
    %c0_3 = arith.constant 0 : index
    %4 = vector.load %arg2[%c0_2, %c0_3] : memref<128x128xbf16, #tpu.memory_space<vmem>>, vector<128x128xbf16>
    %c0_4 = arith.constant 0 : index
    %c0_5 = arith.constant 0 : index
    %5 = vector.load %arg3[%c0_4, %c0_5] : memref<128x128xbf16, #tpu.memory_space<vmem>>, vector<128x128xbf16>
    %cst = arith.constant dense<0.000000e+00> : vector<128x128xf32>
    %6 = tpu.matmul %4, %5, %cst {dimension_numbers = #tpu.dot_dimension_numbers<[1], [0], [0], [1], [0, 0, 1, 1], [], []>} : vector<128x128xbf16>, vector<128x128xbf16>, vector<128x128xf32> -> vector<128x128xf32>
    %7 = arith.addf %3, %6 : vector<128x128xf32>
    %c0_6 = arith.constant 0 : index
    %c0_7 = arith.constant 0 : index
    %8 = vector.load %arg10[%c0_6, %c0_7] : memref<128x128xf32, #tpu.memory_space<vmem>>, vector<128x128xf32>
    tpu.vector_store %arg10[%c0_6, %c0_7], %7 {strides = array<i32>} : memref<128x128xf32, #tpu.memory_space<vmem>>, vector<128x128xf32>,
    %c0_i32_8 = arith.constant 0 : i32
    %9 = arith.cmpi eq, %arg1, %c0_i32_8 : i32
    %10 = arith.extui %9 : i1 to i32
    %c0_i32_9 = arith.constant 0 : i32
    %11 = arith.cmpi ne, %10, %c0_i32_9 : i32
    scf.if %11 {
      %c0_10 = arith.constant 0 : index
      %c0_11 = arith.constant 0 : index
      %12 = vector.load %arg10[%c0_10, %c0_11] : memref<128x128xf32, #tpu.memory_space<vmem>>, vector<128x128xf32>
      %c0_12 = arith.constant 0 : index
      %c0_13 = arith.constant 0 : index
      %13 = vector.load %arg5[%c0_12, %c0_13] : memref<128x1xf32, #tpu.memory_space<vmem>>, vector<128x1xf32>
      %14 = vector.broadcast %13 : vector<128x1xf32> to vector<128x128xf32>
      %15 = arith.mulf %12, %14 : vector<128x128xf32>
      %16 = arith.truncf %15 : vector<128x128xf32> to vector<128x128xbf16>
      %c0_14 = arith.constant 0 : index
      %c0_15 = arith.constant 0 : index
      %17 = vector.load %arg6[%c0_14, %c0_15] : memref<128x128xbf16, #tpu.memory_space<vmem>>, vector<128x128xbf16>
      %cst_16 = arith.constant dense<0.000000e+00> : vector<128x128xf32>
      %18 = tpu.matmul %16, %17, %cst_16 {dimension_numbers = #tpu.dot_dimension_numbers<[1], [0], [0], [1], [0, 0, 1, 1], [], []>} : vector<128x128xbf16>, vector<128x128xbf16>, vector<128x128xf32> -> vector<128x128xf32>
      %c0_17 = arith.constant 0 : index
      %c0_18 = arith.constant 0 : index
      %19 = vector.load %arg4[%c0_17, %c0_18] : memref<128x128xbf16, #tpu.memory_space<vmem>>, vector<128x128xbf16>
      %c0_19 = arith.constant 0 : index
      %c0_20 = arith.constant 0 : index
      %20 = vector.load %arg7[%c0_19, %c0_20] : memref<128x128xbf16, #tpu.memory_space<vmem>>, vector<128x128xbf16>
      %cst_21 = arith.constant dense<0.000000e+00> : vector<128x128xf32>
      %21 = tpu.matmul %19, %20, %cst_21 {dimension_numbers = #tpu.dot_dimension_numbers<[1], [0], [0], [1], [0, 0, 1, 1], [], []>} : vector<128x128xbf16>, vector<128x128xbf16>, vector<128x128xf32> -> vector<128x128xf32>
      %22 = arith.addf %18, %21 : vector<128x128xf32>
      %c0_22 = arith.constant 0 : index
      %c0_23 = arith.constant 0 : index
      %23 = vector.load %arg8[%c0_22, %c0_23] : memref<1x128xf32, #tpu.memory_space<vmem>>, vector<1x128xf32>
      %24 = vector.broadcast %23 : vector<1x128xf32> to vector<128x128xf32>
      %25 = arith.addf %22, %24 : vector<128x128xf32>
      %cst_24 = arith.constant 0.000000e+00 : f32
      %26 = vector.broadcast %cst_24 : f32 to vector<128x128xf32>
      %27 = arith.maximumf %25, %26 : vector<128x128xf32>
      %28 = arith.truncf %27 : vector<128x128xf32> to vector<128x128xbf16>
      %c0_25 = arith.constant 0 : index
      %c0_26 = arith.constant 0 : index
      %29 = vector.load %arg9[%c0_25, %c0_26] : memref<128x128xbf16, #tpu.memory_space<vmem>>, vector<128x128xbf16>
      tpu.vector_store %arg9[%c0_25, %c0_26], %28 {strides = array<i32>} : memref<128x128xbf16, #tpu.memory_space<vmem>>, vector<128x128xbf16>,
    } else {
    }
    return
  }
  func.func @transform_0(%arg0: i32, %arg1: i32) -> (i32, i32) {
    %c0_i32 = arith.constant 0 : i32
    return %arg0, %arg1 : i32, i32
  }
  func.func @transform_1(%arg0: i32, %arg1: i32) -> (i32, i32) {
    %c0_i32 = arith.constant 0 : i32
    %c0_i32_0 = arith.constant 0 : i32
    return %arg1, %c0_i32 : i32, i32
  }
  func.func @transform_2(%arg0: i32, %arg1: i32) -> (i32, i32) {
    %c0_i32 = arith.constant 0 : i32
    %c0_i32_0 = arith.constant 0 : i32
    return %arg0, %c0_i32 : i32, i32
  }
  func.func @transform_3(%arg0: i32, %arg1: i32) -> (i32, i32) {
    %c0_i32 = arith.constant 0 : i32
    %c0_i32_0 = arith.constant 0 : i32
    return %arg0, %c0_i32 : i32, i32
  }
  func.func @transform_4(%arg0: i32, %arg1: i32) -> (i32, i32) {
    %c0_i32 = arith.constant 0 : i32
    %c0_i32_0 = arith.constant 0 : i32
    %c0_i32_1 = arith.constant 0 : i32
    return %c0_i32, %c0_i32_0 : i32, i32
  }
  func.func @transform_5(%arg0: i32, %arg1: i32) -> (i32, i32) {
    %c0_i32 = arith.constant 0 : i32
    %c0_i32_0 = arith.constant 0 : i32
    %c0_i32_1 = arith.constant 0 : i32
    return %c0_i32, %c0_i32_0 : i32, i32
  }
  func.func @transform_6(%arg0: i32, %arg1: i32) -> (i32, i32) {
    %c0_i32 = arith.constant 0 : i32
    %c0_i32_0 = arith.constant 0 : i32
    %c0_i32_1 = arith.constant 0 : i32
    return %c0_i32, %c0_i32_0 : i32, i32
  }
  func.func @transform_7(%arg0: i32, %arg1: i32) -> (i32, i32) {
    %c0_i32 = arith.constant 0 : i32
    %c0_i32_0 = arith.constant 0 : i32
    return %arg0, %c0_i32 : i32, i32
  }
}

module attributes {stable_mosaic.version = 11 : i64} {
  func.func @_sage_layer_kernel(%arg0: i32, %arg1: i32, %arg2: memref<128x128xbf16, #tpu.memory_space<vmem>>, %arg3: memref<128x128xbf16, #tpu.memory_space<vmem>>, %arg4: memref<128x128xbf16, #tpu.memory_space<vmem>>, %arg5: memref<128x1xf32, #tpu.memory_space<vmem>>, %arg6: memref<128x128xbf16, #tpu.memory_space<vmem>>, %arg7: memref<128x128xbf16, #tpu.memory_space<vmem>>, %arg8: memref<1x128xf32, #tpu.memory_space<vmem>>, %arg9: memref<128x128xf32, #tpu.memory_space<vmem>>, %arg10: memref<128x128xf32, #tpu.memory_space<vmem>>) attributes {dimension_semantics = [#tpu.dimension_semantics<parallel>, #tpu.dimension_semantics<arbitrary>], iteration_bounds = array<i64: 1, 1>, scalar_prefetch = 0 : i64, scratch_operands = 1 : i64, tpu.core_type = #tpu.core_type<tc>, window_params = [{transform_indices = @transform_0, window_bounds = array<i64: 128, 128>}, {transform_indices = @transform_1, window_bounds = array<i64: 128, 128>}, {transform_indices = @transform_2, window_bounds = array<i64: 128, 128>}, {transform_indices = @transform_3, window_bounds = array<i64: 128, 1>}, {pipeline_mode = #tpu.pipeline_mode<synchronous>, transform_indices = @transform_4, window_bounds = array<i64: 128, 128>}, {pipeline_mode = #tpu.pipeline_mode<synchronous>, transform_indices = @transform_5, window_bounds = array<i64: 128, 128>}, {pipeline_mode = #tpu.pipeline_mode<synchronous>, transform_indices = @transform_6, window_bounds = array<i64: 1, 128>}, {transform_indices = @transform_7, window_bounds = array<i64: 128, 128>}]} {
    %c0_i32 = arith.constant 0 : i32
    %0 = arith.cmpi eq, %arg1, %c0_i32 : i32
    %1 = arith.extui %0 : i1 to i32
    %c0_i32_0 = arith.constant 0 : i32
    %2 = arith.cmpi ne, %1, %c0_i32_0 : i32
    scf.if %2 {
      %cst_10 = arith.constant 0.000000e+00 : f32
      %12 = vector.broadcast %cst_10 : f32 to vector<128x128xf32>
      %c0_11 = arith.constant 0 : index
      %c0_12 = arith.constant 0 : index
      %13 = vector.load %arg10[%c0_11, %c0_12] : memref<128x128xf32, #tpu.memory_space<vmem>>, vector<128x128xf32>
      tpu.vector_store %arg10[%c0_11, %c0_12], %12 {strides = array<i32>} : memref<128x128xf32, #tpu.memory_space<vmem>>, vector<128x128xf32>,
    } else {
    }
    %c0 = arith.constant 0 : index
    %c0_1 = arith.constant 0 : index
    %3 = vector.load %arg10[%c0, %c0_1] : memref<128x128xf32, #tpu.memory_space<vmem>>, vector<128x128xf32>
    %c0_2 = arith.constant 0 : index
    %c0_3 = arith.constant 0 : index
    %4 = vector.load %arg2[%c0_2, %c0_3] : memref<128x128xbf16, #tpu.memory_space<vmem>>, vector<128x128xbf16>
    %c0_4 = arith.constant 0 : index
    %c0_5 = arith.constant 0 : index
    %5 = vector.load %arg3[%c0_4, %c0_5] : memref<128x128xbf16, #tpu.memory_space<vmem>>, vector<128x128xbf16>
    %cst = arith.constant dense<0.000000e+00> : vector<128x128xf32>
    %6 = tpu.matmul %4, %5, %cst {dimension_numbers = #tpu.dot_dimension_numbers<[1], [0], [0], [1], [0, 0, 1, 1], [], []>} : vector<128x128xbf16>, vector<128x128xbf16>, vector<128x128xf32> -> vector<128x128xf32>
    %7 = arith.addf %3, %6 : vector<128x128xf32>
    %c0_6 = arith.constant 0 : index
    %c0_7 = arith.constant 0 : index
    %8 = vector.load %arg10[%c0_6, %c0_7] : memref<128x128xf32, #tpu.memory_space<vmem>>, vector<128x128xf32>
    tpu.vector_store %arg10[%c0_6, %c0_7], %7 {strides = array<i32>} : memref<128x128xf32, #tpu.memory_space<vmem>>, vector<128x128xf32>,
    %c0_i32_8 = arith.constant 0 : i32
    %9 = arith.cmpi eq, %arg1, %c0_i32_8 : i32
    %10 = arith.extui %9 : i1 to i32
    %c0_i32_9 = arith.constant 0 : i32
    %11 = arith.cmpi ne, %10, %c0_i32_9 : i32
    scf.if %11 {
      %c0_10 = arith.constant 0 : index
      %c0_11 = arith.constant 0 : index
      %12 = vector.load %arg10[%c0_10, %c0_11] : memref<128x128xf32, #tpu.memory_space<vmem>>, vector<128x128xf32>
      %c0_12 = arith.constant 0 : index
      %c0_13 = arith.constant 0 : index
      %13 = vector.load %arg5[%c0_12, %c0_13] : memref<128x1xf32, #tpu.memory_space<vmem>>, vector<128x1xf32>
      %14 = vector.broadcast %13 : vector<128x1xf32> to vector<128x128xf32>
      %15 = arith.mulf %12, %14 : vector<128x128xf32>
      %16 = arith.truncf %15 : vector<128x128xf32> to vector<128x128xbf16>
      %c0_14 = arith.constant 0 : index
      %c0_15 = arith.constant 0 : index
      %17 = vector.load %arg6[%c0_14, %c0_15] : memref<128x128xbf16, #tpu.memory_space<vmem>>, vector<128x128xbf16>
      %cst_16 = arith.constant dense<0.000000e+00> : vector<128x128xf32>
      %18 = tpu.matmul %16, %17, %cst_16 {dimension_numbers = #tpu.dot_dimension_numbers<[1], [0], [0], [1], [0, 0, 1, 1], [], []>} : vector<128x128xbf16>, vector<128x128xbf16>, vector<128x128xf32> -> vector<128x128xf32>
      %c0_17 = arith.constant 0 : index
      %c0_18 = arith.constant 0 : index
      %19 = vector.load %arg4[%c0_17, %c0_18] : memref<128x128xbf16, #tpu.memory_space<vmem>>, vector<128x128xbf16>
      %c0_19 = arith.constant 0 : index
      %c0_20 = arith.constant 0 : index
      %20 = vector.load %arg7[%c0_19, %c0_20] : memref<128x128xbf16, #tpu.memory_space<vmem>>, vector<128x128xbf16>
      %cst_21 = arith.constant dense<0.000000e+00> : vector<128x128xf32>
      %21 = tpu.matmul %19, %20, %cst_21 {dimension_numbers = #tpu.dot_dimension_numbers<[1], [0], [0], [1], [0, 0, 1, 1], [], []>} : vector<128x128xbf16>, vector<128x128xbf16>, vector<128x128xf32> -> vector<128x128xf32>
      %22 = arith.addf %18, %21 : vector<128x128xf32>
      %c0_22 = arith.constant 0 : index
      %c0_23 = arith.constant 0 : index
      %23 = vector.load %arg8[%c0_22, %c0_23] : memref<1x128xf32, #tpu.memory_space<vmem>>, vector<1x128xf32>
      %24 = vector.broadcast %23 : vector<1x128xf32> to vector<128x128xf32>
      %25 = arith.addf %22, %24 : vector<128x128xf32>
      %c0_24 = arith.constant 0 : index
      %c0_25 = arith.constant 0 : index
      %26 = vector.load %arg9[%c0_24, %c0_25] : memref<128x128xf32, #tpu.memory_space<vmem>>, vector<128x128xf32>
      tpu.vector_store %arg9[%c0_24, %c0_25], %25 {strides = array<i32>} : memref<128x128xf32, #tpu.memory_space<vmem>>, vector<128x128xf32>,
    } else {
    }
    return
  }
  func.func @transform_0(%arg0: i32, %arg1: i32) -> (i32, i32) {
    %c0_i32 = arith.constant 0 : i32
    return %arg0, %arg1 : i32, i32
  }
  func.func @transform_1(%arg0: i32, %arg1: i32) -> (i32, i32) {
    %c0_i32 = arith.constant 0 : i32
    %c0_i32_0 = arith.constant 0 : i32
    return %arg1, %c0_i32 : i32, i32
  }
  func.func @transform_2(%arg0: i32, %arg1: i32) -> (i32, i32) {
    %c0_i32 = arith.constant 0 : i32
    %c0_i32_0 = arith.constant 0 : i32
    return %arg0, %c0_i32 : i32, i32
  }
  func.func @transform_3(%arg0: i32, %arg1: i32) -> (i32, i32) {
    %c0_i32 = arith.constant 0 : i32
    %c0_i32_0 = arith.constant 0 : i32
    return %arg0, %c0_i32 : i32, i32
  }
  func.func @transform_4(%arg0: i32, %arg1: i32) -> (i32, i32) {
    %c0_i32 = arith.constant 0 : i32
    %c0_i32_0 = arith.constant 0 : i32
    %c0_i32_1 = arith.constant 0 : i32
    return %c0_i32, %c0_i32_0 : i32, i32
  }
  func.func @transform_5(%arg0: i32, %arg1: i32) -> (i32, i32) {
    %c0_i32 = arith.constant 0 : i32
    %c0_i32_0 = arith.constant 0 : i32
    %c0_i32_1 = arith.constant 0 : i32
    return %c0_i32, %c0_i32_0 : i32, i32
  }
  func.func @transform_6(%arg0: i32, %arg1: i32) -> (i32, i32) {
    %c0_i32 = arith.constant 0 : i32
    %c0_i32_0 = arith.constant 0 : i32
    %c0_i32_1 = arith.constant 0 : i32
    return %c0_i32, %c0_i32_0 : i32, i32
  }
  func.func @transform_7(%arg0: i32, %arg1: i32) -> (i32, i32) {
    %c0_i32 = arith.constant 0 : i32
    %c0_i32_0 = arith.constant 0 : i32
    return %arg0, %c0_i32 : i32, i32
  }
}

</mosaic_0001>

<bundles_post_ra>
// kernel: sage_encoder_pallas.2
= control target key start
LH: loop header
LB: loop body
LE: loop exit
PB: predicated region body
PF: predicated region fallthrough
CT: control target
= control target key end

     0   :  { %v1291_v1 = vmov 0   ;;  %s1551_s1 = inlined_call_operand.vmem [shape: bf16[128,128], index: 1, kind: input, shape index: {}, may-alias: {1,2}]   ;;  %s1552_s0 = inlined_call_operand.vmem [shape: bf16[128,128], index: 0, kind: input, shape index: {}]   ;;  %s1553_s3 = inlined_call_operand.vmem [shape: f32[128,1], index: 3, kind: input, shape index: {}]   ;;  %s1554_s5 = inlined_call_operand.vmem [shape: bf16[128,128], index: 5, kind: input, shape index: {}]   ;;  %s1555_s4 = inlined_call_operand.vmem [shape: bf16[128,128], index: 4, kind: input, shape index: {}]   ;;  %s1556_s2 = inlined_call_operand.vmem [shape: bf16[128,128], index: 2, kind: input, shape index: {}, may-alias: {1,2}]   ;;  %s1557_s6 = inlined_call_operand.vmem [shape: f32[1,128], index: 6, kind: input, shape index: {}]   ;;  %s1558_s7 = inlined_call_operand.vmem [shape: bf16[128,128], index: 7, kind: output, shape index: {}]  }
   0x1   :  { %v1251_v0 = vld [vmem:[%s1551_s1 + $0x38] sm:$0xff]   ;;  %1250 = vset.pattern.permute.xlu1 %v1291_v1  ;;  %1249 = vset.pattern.permute.xlu0 %v1291_v1  ;;  %v1252_v2 = vld [vmem:[%s1551_s1 + $0x30] sm:$0xff]   ;;  %v1253_v3 = vld [vmem:[%s1551_s1 + $0x28] sm:$0xff]  }
   0x2   :  { %1136 = vmatprep.subr.bf16.mxu0 %v1251_v0  ;;  %v1254_v4 = vld [vmem:[%s1551_s1 + $0x20] sm:$0xff]   ;;  %v1255_v6 = vld [vmem:[%s1551_s1 + $0x18] sm:$0xff]   ;;  %v1256_v7 = vld [vmem:[%s1551_s1 + $0x10] sm:$0xff]  }
   0x3   :  { %1137 = vmatpush3.bf16.msra.mxu0 %v1251_v0  ;;  %v1259_v5 = vld [vmem:[%s1552_s0] sm:$0xff]   ;;  %v348_v10 = vld [vmem:[%s1553_s3 + $0x48] sm:$0xff]  ;;  %v342_v13 = vld [vmem:[%s1553_s3 + $0x18] sm:$0xff] }
   0x4   :  { %1138 = vmatprep.subr.bf16.mxu0 %v1252_v2  ;;  %1152 = vmatprep.mubr.bf16.mxu0 %v1259_v5  ;;  %v347_v8 = vld [vmem:[%s1553_s3 + $0x40] sm:$0xff]  ;;  %v340_v11 = vld [vmem:[%s1553_s3 + $0x8] sm:$0xff]  ;;  %v341_v14 = vld [vmem:[%s1553_s3 + $0x10] sm:$0xff] }
   0x5   :  { %v339_v9 = vld [vmem:[%s1553_s3] sm:$0xff]  ;;  %397 = vperm.xlu1 %1250, %v347_v8   ;;  %v1257_v12 = vld [vmem:[%s1551_s1 + $0x8] sm:$0xff]   ;;  %v1267_v15 = vld [vmem:[%s1554_s5 + $0x38] sm:$0xff]  }
   0x6   :  { %357 = vperm.xlu0 %1249, %v339_v9   ;;  %v1268_v16 = vld [vmem:[%s1554_s5 + $0x30] sm:$0xff]   ;;  %v1258_v17 = vld [vmem:[%s1551_s1] sm:$0xff]   ;;  %1168 = vmatprep.subr.bf16.mxu1 %v1267_v15  ;;  %v350_v18 = vld [vmem:[%s1553_s3 + $0x58] sm:$0xff] }
   0x7   :  { %1139 = vmatpush3.bf16.msra.mxu0 %v1252_v2  ;;  %v349_v19 = vld [vmem:[%s1553_s3 + $0x50] sm:$0xff]  ;;  %1169 = vmatpush3.bf16.msra.mxu1 %v1267_v15  ;;  %v1269_v20 = vld [vmem:[%s1554_s5 + $0x28] sm:$0xff]   ;;  %v1398_v22 = vld [vmem:[%s1555_s4 + $0x38] sm:$0xff]  }
   0x8   :  { %1140 = vmatprep.subr.bf16.mxu0 %v1253_v3  ;;  %1170 = vmatprep.subr.bf16.mxu1 %v1268_v16  ;;  %v1260_v21 = vld [vmem:[%s1552_s0 + $0x8] sm:$0xff]   ;;  %v1261_v23 = vld [vmem:[%s1552_s0 + $0x10] sm:$0xff]   ;;  %v343_v25 = vld [vmem:[%s1553_s3 + $0x20] sm:$0xff] }
   0x9   :  { %402 = vperm.xlu1 %1250, %v348_v10   ;;  %v344_v24 = vld [vmem:[%s1553_s3 + $0x28] sm:$0xff]  ;;  %v1270_v26 = vld [vmem:[%s1554_s5 + $0x20] sm:$0xff]   ;;  %v1275_v30 = vld [vmem:[%s1555_s4 + $0x30] sm:$0xff]  }
   0xa   :  { %362 = vperm.xlu0 %1249, %v340_v11   ;;  %v352_v27 = vld [vmem:[%s1553_s3 + $0x68] sm:$0xff]  ;;  %v351_v28 = vld [vmem:[%s1553_s3 + $0x60] sm:$0xff]  ;;  %v1271_v31 = vld [vmem:[%s1554_s5 + $0x18] sm:$0xff]  }
   0xb   :  { %1141 = vmatpush3.bf16.msra.mxu0 %v1253_v3  ;;  %1171 = vmatpush3.bf16.msra.mxu1 %v1268_v16  ;;  %v1278_v29 = vld [vmem:[%s1556_s2] sm:$0xff]   ;;  %v1262_v32 = vld [vmem:[%s1552_s0 + $0x18] sm:$0xff]   ;;  %v345_v34 = vld [vmem:[%s1553_s3 + $0x30] sm:$0xff] }
   0xc   :  { %1142 = vmatprep.subr.bf16.mxu0 %v1254_v4  ;;  %1172 = vmatprep.subr.bf16.mxu1 %v1269_v20  ;;  %v346_v33 = vld [vmem:[%s1553_s3 + $0x38] sm:$0xff]  ;;  %v1263_v35 = vld [vmem:[%s1552_s0 + $0x20] sm:$0xff]   ;;  %v1272_v36 = vld [vmem:[%s1554_s5 + $0x10] sm:$0xff]  }
   0xd   :  { %372 = vperm.xlu1 %1250, %v342_v13   ;;  %1184 = vmatprep.mubr.bf16.mxu1 %v1278_v29  ;;  %v1277_v37 = vld [vmem:[%s1555_s4 + $0x28] sm:$0xff]   ;;  %v354_v38 = vld [vmem:[%s1553_s3 + $0x78] sm:$0xff]  ;;  %v353_v39 = vld [vmem:[%s1553_s3 + $0x70] sm:$0xff] }
   0xe   :  { %367 = vperm.xlu0 %1249, %v341_v14   ;;  %v1274_v40 = vld [vmem:[%s1554_s5 + $0x8] sm:$0xff]   ;;  %v1280_v41 = vld [vmem:[%s1555_s4 + $0x20] sm:$0xff]   ;;  %v1265_v43 = vld [vmem:[%s1552_s0 + $0x30] sm:$0xff]  }
   0xf   :  { %1143 = vmatpush3.bf16.msra.mxu0 %v1254_v4  ;;  %1173 = vmatpush3.bf16.msra.mxu1 %v1269_v20  ;;  %v1264_v42 = vld [vmem:[%s1552_s0 + $0x28] sm:$0xff]   ;;  %v1276_v44 = vld [vmem:[%s1554_s5] sm:$0xff]   ;;  %v1281_v45 = vld [vmem:[%s1555_s4 + $0x18] sm:$0xff]  }
  0x10   :  { %1144 = vmatprep.subr.bf16.mxu0 %v1255_v6  ;;  %1174 = vmatprep.subr.bf16.mxu1 %v1270_v26  ;;  %v1279_v46 = vld [vmem:[%s1556_s2 + $0x8] sm:$0xff]   ;;  %v1266_v47 = vld [vmem:[%s1552_s0 + $0x38] sm:$0xff]   ;;  %v1282_v48 = vld [vmem:[%s1556_s2 + $0x10] sm:$0xff]  }
  0x11   :  { %412 = vperm.xlu1 %1250, %v350_v18   ;;  %v1283_v49 = vld [vmem:[%s1556_s2 + $0x18] sm:$0xff]   ;;  %v1284_v50 = vld [vmem:[%s1555_s4 + $0x10] sm:$0xff]   ;;  %v1285_v51 = vld [vmem:[%s1555_s4 + $0x8] sm:$0xff]  }
  0x12   :  { %407 = vperm.xlu0 %1249, %v349_v19   ;;  %v1286_v52 = vld [vmem:[%s1556_s2 + $0x20] sm:$0xff]   ;;  %v1287_v53 = vld [vmem:[%s1556_s2 + $0x28] sm:$0xff]   ;;  %v1289_v55 = vld [vmem:[%s1556_s2 + $0x30] sm:$0xff]  }
  0x13   :  { %1145 = vmatpush3.bf16.msra.mxu0 %v1255_v6  ;;  %1175 = vmatpush3.bf16.msra.mxu1 %v1270_v26  ;;  %v1288_v54 = vld [vmem:[%s1555_s4] sm:$0xff]   ;;  %v1290_v56 = vld [vmem:[%s1556_s2 + $0x38] sm:$0xff]  }
  0x14   :  { %1146 = vmatprep.subr.bf16.mxu0 %v1256_v7  ;;  %1176 = vmatprep.subr.bf16.mxu1 %v1271_v31 }
  0x15   :  { %382 = vperm.xlu1 %1250, %v344_v24  }
  0x16   :  { %377 = vperm.xlu0 %1249, %v343_v25  }
  0x17   :  { %1147 = vmatpush3.bf16.msra.mxu0 %v1256_v7  ;;  %1177 = vmatpush3.bf16.msra.mxu1 %v1271_v31 }
  0x18   :  { %1148 = vmatprep.subr.bf16.mxu0 %v1257_v12  ;;  %1178 = vmatprep.subr.bf16.mxu1 %v1272_v36 }
  0x19   :  { %422 = vperm.xlu1 %1250, %v352_v27  }
  0x1a   :  { %417 = vperm.xlu0 %1249, %v351_v28  }
  0x1b   :  { %1149 = vmatpush3.bf16.msra.mxu0 %v1257_v12  ;;  %1179 = vmatpush3.bf16.msra.mxu1 %v1272_v36 }
  0x1c   :  { %1150 = vmatprep.subr.bf16.mxu0 %v1258_v17  ;;  %1180 = vmatprep.subr.bf16.mxu1 %v1274_v40 }
  0x1d   :  { %392 = vperm.xlu1 %1250, %v346_v33  }
  0x1e   :  { %387 = vperm.xlu0 %1249, %v345_v34  }
  0x1f   :  { %1151 = vmatpush3.bf16.msra.mxu0 %v1258_v17  ;;  %1181 = vmatpush3.bf16.msra.mxu1 %v1274_v40 }
  0x20   :  { %1200 = vmatprep.subr.bf16.mxu0 %v1398_v22  ;;  %1182 = vmatprep.subr.bf16.mxu1 %v1276_v44 }
  0x21   :  { %432 = vperm.xlu1 %1250, %v354_v38  }
  0x22   :  { %1153 = vmatmul.mubr.bf16.vlgmr.msra.gmra.mxu0 %v1260_v21  ;;  %427 = vperm.xlu0 %1249, %v353_v39  }
  0x23   :  { %1156 = vmatprep.mubr.bf16.mxu0 %v1261_v23  ;;  %1201 = vmatpush3.bf16.msra.mxu0 %v1398_v22 }
  0x24   :  { %1202 = vmatprep.subr.bf16.mxu0 %v1275_v30  ;;  %1183 = vmatpush3.bf16.msra.mxu1 %v1276_v44 }
  0x25   :  { %1232 = vmatprep.subr.bf16.mxu1 %v1398_v22 }
  0x27   :  { %1203 = vmatpush3.bf16.msra.mxu0 %v1275_v30  ;;  %1185 = vmatmul.mubr.bf16.vlgmr.msra.gmra.mxu1 %v1279_v46 }
  0x28   :  { %1204 = vmatprep.subr.bf16.mxu0 %v1277_v37  ;;  %1240 = vmatpush3.bf16.msra.mxu1 %v1398_v22 }
  0x29   :  { %1188 = vmatprep.mubr.bf16.mxu1 %v1282_v48  ;;  %1233 = vmatprep.subr.bf16.mxu1 %v1275_v30 }
  0x2a   :  { %1157 = vmatmul.mubr.bf16.gmra.mxu0 %v1262_v32 }
  0x2b   :  { %1160 = vmatprep.mubr.bf16.mxu0 %v1263_v35  ;;  %1205 = vmatpush3.bf16.msra.mxu0 %v1277_v37 }
  0x2c   :  { %1206 = vmatprep.subr.bf16.mxu0 %v1280_v41  ;;  %1241 = vmatpush3.bf16.msra.mxu1 %v1275_v30 }
  0x2d   :  { %1234 = vmatprep.subr.bf16.mxu1 %v1277_v37 }
  0x2f   :  { %1207 = vmatpush3.bf16.msra.mxu0 %v1280_v41  ;;  %1189 = vmatmul.mubr.bf16.gmra.mxu1 %v1283_v49 }
  0x30   :  { %1208 = vmatprep.subr.bf16.mxu0 %v1281_v45  ;;  %1242 = vmatpush3.bf16.msra.mxu1 %v1277_v37 }
  0x31   :  { %1235 = vmatprep.subr.bf16.mxu1 %v1280_v41  ;;  %1192 = vmatprep.mubr.bf16.mxu1 %v1286_v52 }
  0x32   :  { %1161 = vmatmul.mubr.bf16.gmra.mxu0 %v1264_v42 }
  0x33   :  { %1164 = vmatprep.mubr.bf16.mxu0 %v1265_v43  ;;  %1209 = vmatpush3.bf16.msra.mxu0 %v1281_v45 }
  0x34   :  { %1243 = vmatpush3.bf16.msra.mxu1 %v1280_v41  ;;  %1210 = vmatprep.subr.bf16.mxu0 %v1284_v50 }
  0x35   :  { %1236 = vmatprep.subr.bf16.mxu1 %v1281_v45 }
  0x37   :  { %1211 = vmatpush3.bf16.msra.mxu0 %v1284_v50  ;;  %1193 = vmatmul.mubr.bf16.gmra.mxu1 %v1287_v53 }
  0x38   :  { %1244 = vmatpush3.bf16.msra.mxu1 %v1281_v45  ;;  %1212 = vmatprep.subr.bf16.mxu0 %v1285_v51 }
  0x39   :  { %1237 = vmatprep.subr.bf16.mxu1 %v1284_v50  ;;  %1196 = vmatprep.mubr.bf16.mxu1 %v1289_v55 }
  0x3a   :  { %1165 = vmatmul.mubr.bf16.gmra.mxu0 %v1266_v47 }
  0x3b   :  { %1213 = vmatpush3.bf16.msra.mxu0 %v1285_v51 }
  0x3c   :  { %1245 = vmatpush3.bf16.msra.mxu1 %v1284_v50  ;;  %1214 = vmatprep.subr.bf16.mxu0 %v1288_v54 }
  0x3d   :  { %1238 = vmatprep.subr.bf16.mxu1 %v1285_v51 }
  0x3f   :  { %1215 = vmatpush3.bf16.msra.mxu0 %v1288_v54  ;;  %1197 = vmatmul.mubr.bf16.gmra.mxu1 %v1290_v56 }
  0x40   :  { %1246 = vmatpush3.bf16.msra.mxu1 %v1285_v51 }
  0x41   :  { %1239 = vmatprep.subr.bf16.mxu1 %v1288_v54 }
  0x44   :  { %1247 = vmatpush3.bf16.msra.mxu1 %v1288_v54 }
  0x80   :  { %v398_v57 = vpop.permute.xlu1 %397 }
  0x81   :  { %v358_v58 = vpop.permute.xlu0 %357 }
  0x84   :  { %v403_v59 = vpop.permute.xlu1 %402 }
  0x85   :  { %v363_v60 = vpop.permute.xlu0 %362 }
  0x88   :  { %v373_v61 = vpop.permute.xlu1 %372 }
  0x89   :  { %v368_v62 = vpop.permute.xlu0 %367 }
  0x8c   :  { %v413_v63 = vpop.permute.xlu1 %412 }
  0x8d   :  { %v408_v0 = vpop.permute.xlu0 %407 }
  0x90   :  { %v383_v2 = vpop.permute.xlu1 %382 }
  0x91   :  { %v378_v4 = vpop.permute.xlu0 %377 }
  0x94   :  { %v423_v8 = vpop.permute.xlu1 %422 }
  0x95   :  { %v418_v13 = vpop.permute.xlu0 %417 }
  0x98   :  { %v393_v18 = vpop.permute.xlu1 %392 }
  0x99   :  { %v388_v21 = vpop.permute.xlu0 %387 }
  0x9c   :  { %v433_v40 = vpop.permute.xlu1 %432 }
  0x9d   :  { %v428_v43 = vpop.permute.xlu0 %427 }
  0xe2   :  { %v1154_v1 = vpop.f32.mrf.mxu0 }
  0xe3   :  { %v437_v11 = vmul.f32 %v1154_v1, %v368_v62 }
  0xe4   :  { %v225_v3 = vpop.f32.mrf.mxu0 }
  0xe5   :  { %v435_v9 = vmul.f32 %v358_v58, %v225_v3 }
  0xe6   :  { %v1155_v5 = vpop.f32.mrf.mxu0 }
  0xe7   :  { %v438_v6 = vmul.f32 %v1155_v5, %v373_v61  ;;  %v1186_v49 = vpop.f32.mrf.mxu1 }
  0xe8   :  { %v228_v7 = vpop.f32.mrf.mxu0 }
  0xe9   :  { %v436_v10 = vmul.f32 %v363_v60, %v228_v7  ;;  %v452_v15 = vpack.c.bf16 %v438_v6, %v437_v11  ;;  %v637_v50 = vpop.f32.mrf.mxu1 }
  0xea   :  { %v1158_v12 = vpop.f32.mrf.mxu0 }
  0xeb   :  { %v451_v14 = vpack.c.bf16 %v436_v10, %v435_v9  ;;  %v441_v24 = vmul.f32 %v1158_v12, %v388_v21  ;;  %v1187_v51 = vpop.f32.mrf.mxu1 }
  0xec   :  { %v241_v16 = vpop.f32.mrf.mxu0 }
  0xed   :  { %1216 = vmatprep.mubr.bf16.mxu0 %v451_v14  ;;  %v439_v22 = vmul.f32 %v378_v4, %v241_v16  ;;  %v640_v52 = vpop.f32.mrf.mxu1 }
  0xee   :  { %v1159_v17 = vpop.f32.mrf.mxu0  ;;  %1217 = vmatmul.mubr.bf16.vlgmr.msra.gmra.mxu0 %v452_v15 }
  0xef   :  { %v442_v19 = vmul.f32 %v1159_v17, %v393_v18  ;;  %v1190_v53 = vpop.f32.mrf.mxu1 }
  0xf0   :  { %v244_v20 = vpop.f32.mrf.mxu0 }
  0xf1   :  { %v440_v23 = vmul.f32 %v383_v2, %v244_v20  ;;  %v454_v27 = vpack.c.bf16 %v442_v19, %v441_v24  ;;  %v653_v54 = vpop.f32.mrf.mxu1 }
  0xf2   :  { %v1162_v25 = vpop.f32.mrf.mxu0 }
  0xf3   :  { %v453_v26 = vpack.c.bf16 %v440_v23, %v439_v22  ;;  %v445_v34 = vmul.f32 %v1162_v25, %v408_v0  ;;  %v1191_v55 = vpop.f32.mrf.mxu1 }
  0xf4   :  { %v257_v28 = vpop.f32.mrf.mxu0 }
  0xf5   :  { %1220 = vmatprep.mubr.bf16.mxu0 %v453_v26  ;;  %v443_v32 = vmul.f32 %v398_v57, %v257_v28  ;;  %v656_v56 = vpop.f32.mrf.mxu1 }
  0xf6   :  { %v1163_v29 = vpop.f32.mrf.mxu0  ;;  %1221 = vmatmul.mubr.bf16.gmra.mxu0 %v454_v27 }
  0xf7   :  { %v446_v30 = vmul.f32 %v1163_v29, %v413_v63  ;;  %v1194_v57 = vpop.f32.mrf.mxu1  ;;  %v1509_v63 = vld [vmem:[%s1557_s6] ss:$0 sm:$0xff] }
  0xf8   :  { %v260_v31 = vpop.f32.mrf.mxu0 }
  0xf9   :  { %v444_v33 = vmul.f32 %v403_v59, %v260_v31  ;;  %v456_v37 = vpack.c.bf16 %v446_v30, %v445_v34  ;;  %v669_v58 = vpop.f32.mrf.mxu1 }
  0xfa   :  { %v1166_v35 = vpop.f32.mrf.mxu0 }
  0xfb   :  { %v455_v36 = vpack.c.bf16 %v444_v33, %v443_v32  ;;  %v449_v46 = vmul.f32 %v1166_v35, %v428_v43  ;;  %v1195_v59 = vpop.f32.mrf.mxu1 }
  0xfc   :  { %v273_v38 = vpop.f32.mrf.mxu0 }
  0xfd   :  { %1224 = vmatprep.mubr.bf16.mxu1 %v455_v36  ;;  %v447_v44 = vmul.f32 %v418_v13, %v273_v38  ;;  %v672_v60 = vpop.f32.mrf.mxu1 }
  0xfe   :  { %v1167_v39 = vpop.f32.mrf.mxu0  ;;  %1225 = vmatmul.mubr.bf16.vlgmr.msra.gmra.mxu1 %v456_v37 }
  0xff   :  { %v450_v41 = vmul.f32 %v1167_v39, %v433_v40  ;;  %v1198_v0 = vpop.f32.mrf.mxu1 }
 0x100   :  { %v276_v42 = vpop.f32.mrf.mxu0 }
 0x101   :  { %v448_v45 = vmul.f32 %v423_v8, %v276_v42  ;;  %v458_v48 = vpack.c.bf16 %v450_v41, %v449_v46  ;;  %v685_v6 = vpop.f32.mrf.mxu1 }
 0x103   :  { %v457_v47 = vpack.c.bf16 %v448_v45, %v447_v44  ;;  %v1199_v16 = vpop.f32.mrf.mxu1 }
 0x105   :  { %1228 = vmatprep.mubr.bf16.mxu1 %v457_v47  ;;  %v688_v26 = vpop.f32.mrf.mxu1 }
 0x106   :  { %1229 = vmatmul.mubr.bf16.gmra.mxu1 %v458_v48 }
 0x1ae   :  { %v1218_v61 = vpop.f32.mrf.mxu0 }
 0x1af   :  { %v791_v62 = vadd.f32 %v1218_v61, %v1186_v49 }
 0x1b0   :  { %v782_v1 = vpop.f32.mrf.mxu0 }
 0x1b1   :  { %v783_v2 = vadd.f32 %v782_v1, %v637_v50  ;;  %v854_v4 = vadd.f32 %v1509_v63, %v791_v62 }
 0x1b2   :  { %v1219_v3 = vpop.f32.mrf.mxu0 }
 0x1b3   :  { %v794_v5 = vadd.f32 %v1219_v3, %v1187_v51  ;;  %v852_v8 = vadd.f32 %v1509_v63, %v783_v2  ;;  %v870_v12 = vmax.f32 %v854_v4, 0.0 }
 0x1b4   :  { %v785_v7 = vpop.f32.mrf.mxu0 }
 0x1b5   :  { %v855_v9 = vadd.f32 %v1509_v63, %v794_v5  ;;  %v786_v10 = vadd.f32 %v785_v7, %v640_v52  ;;  %v868_v18 = vmax.f32 %v852_v8, 0.0 }
 0x1b6   :  { %v1222_v11 = vpop.f32.mrf.mxu0 }
 0x1b7   :  { %v871_v13 = vmax.f32 %v855_v9, 0.0  ;;  %v853_v14 = vadd.f32 %v1509_v63, %v786_v10  ;;  %v807_v15 = vadd.f32 %v1222_v11, %v1190_v53 }
 0x1b8   :  { %v798_v17 = vpop.f32.mrf.mxu0 }
 0x1b9   :  { %v1049_v19 = vpack.c.bf16 %v871_v13, %v870_v12  ;;  %v869_v20 = vmax.f32 %v853_v14, 0.0  ;;  %v799_v21 = vadd.f32 %v798_v17, %v653_v54  ;;  %v858_v24 = vadd.f32 %v1509_v63, %v807_v15 }
 0x1ba   :  { %v1223_v22 = vpop.f32.mrf.mxu0 }
 0x1bb   :  { %1081 = vst [vmem:[%s1558_s7 + $0x8] sm:$0xff] %v1049_v19   ;;  %v1044_v23 = vpack.c.bf16 %v869_v20, %v868_v18  ;;  %v810_v25 = vadd.f32 %v1223_v22, %v1191_v55  ;;  %v856_v28 = vadd.f32 %v1509_v63, %v799_v21  ;;  %v874_v32 = vmax.f32 %v858_v24, 0.0 }
 0x1bc   :  { %v801_v27 = vpop.f32.mrf.mxu0 }
 0x1bd   :  { %1045 = vst [vmem:[%s1558_s7] sm:$0xff] %v1044_v23   ;;  %v859_v29 = vadd.f32 %v1509_v63, %v810_v25  ;;  %v802_v30 = vadd.f32 %v801_v27, %v656_v56  ;;  %v872_v37 = vmax.f32 %v856_v28, 0.0 }
 0x1be   :  { %v1226_v31 = vpop.f32.mrf.mxu1 }
 0x1bf   :  { %v875_v33 = vmax.f32 %v859_v29, 0.0  ;;  %v857_v34 = vadd.f32 %v1509_v63, %v802_v30  ;;  %v823_v35 = vadd.f32 %v1226_v31, %v1194_v57 }
 0x1c0   :  { %v814_v36 = vpop.f32.mrf.mxu1 }
 0x1c1   :  { %v1059_v38 = vpack.c.bf16 %v875_v33, %v874_v32  ;;  %v873_v39 = vmax.f32 %v857_v34, 0.0  ;;  %v815_v40 = vadd.f32 %v814_v36, %v669_v58  ;;  %v862_v43 = vadd.f32 %v1509_v63, %v823_v35 }
 0x1c2   :  { %v1227_v41 = vpop.f32.mrf.mxu1 }
 0x1c3   :  { %1083 = vst [vmem:[%s1558_s7 + $0x18] sm:$0xff] %v1059_v38   ;;  %v1054_v42 = vpack.c.bf16 %v873_v39, %v872_v37  ;;  %v826_v44 = vadd.f32 %v1227_v41, %v1195_v59  ;;  %v860_v46 = vadd.f32 %v1509_v63, %v815_v40  ;;  %v878_v50 = vmax.f32 %v862_v43, 0.0 }
 0x1c4   :  { %v817_v45 = vpop.f32.mrf.mxu1 }
 0x1c5   :  { %1082 = vst [vmem:[%s1558_s7 + $0x10] sm:$0xff] %v1054_v42   ;;  %v863_v47 = vadd.f32 %v1509_v63, %v826_v44  ;;  %v818_v48 = vadd.f32 %v817_v45, %v672_v60  ;;  %v876_v55 = vmax.f32 %v860_v46, 0.0 }
 0x1c6   :  { %v1230_v49 = vpop.f32.mrf.mxu1 }
 0x1c7   :  { %v879_v51 = vmax.f32 %v863_v47, 0.0  ;;  %v861_v52 = vadd.f32 %v1509_v63, %v818_v48  ;;  %v839_v53 = vadd.f32 %v1230_v49, %v1198_v0 }
 0x1c8   :  { %v830_v54 = vpop.f32.mrf.mxu1 }
 0x1c9   :  { %v1069_v56 = vpack.c.bf16 %v879_v51, %v878_v50  ;;  %v877_v57 = vmax.f32 %v861_v52, 0.0  ;;  %v831_v58 = vadd.f32 %v830_v54, %v685_v6  ;;  %v866_v62 = vadd.f32 %v1509_v63, %v839_v53 }
 0x1ca   :  { %v1231_v59 = vpop.f32.mrf.mxu1 }
 0x1cb   :  { %1085 = vst [vmem:[%s1558_s7 + $0x28] sm:$0xff] %v1069_v56   ;;  %v1064_v61 = vpack.c.bf16 %v877_v57, %v876_v55  ;;  %v842_v60 = vadd.f32 %v1231_v59, %v1199_v16  ;;  %v864_v0 = vadd.f32 %v1509_v63, %v831_v58  ;;  %v882_v4 = vmax.f32 %v866_v62, 0.0 }
 0x1cc   :  { %v833_v1 = vpop.f32.mrf.mxu1 }
 0x1cd   :  { %1084 = vst [vmem:[%s1558_s7 + $0x20] sm:$0xff] %v1064_v61   ;;  %v867_v2 = vadd.f32 %v1509_v63, %v842_v60  ;;  %v834_v3 = vadd.f32 %v833_v1, %v688_v26  ;;  %v880_v7 = vmax.f32 %v864_v0, 0.0 }
 0x1cf   :  { %v883_v5 = vmax.f32 %v867_v2, 0.0  ;;  %v865_v6 = vadd.f32 %v1509_v63, %v834_v3 }
 0x1d1   :  { %v1079_v8 = vpack.c.bf16 %v883_v5, %v882_v4  ;;  %v881_v9 = vmax.f32 %v865_v6, 0.0 }
 0x1d3   :  { %1087 = vst [vmem:[%s1558_s7 + $0x38] sm:$0xff] %v1079_v8   ;;  %v1074_v10 = vpack.c.bf16 %v881_v9, %v880_v7 }
 0x1d5   :  { %1086 = vst [vmem:[%s1558_s7 + $0x30] sm:$0xff] %v1074_v10  }

// kernel: sage_encoder_pallas.3
= control target key start
LH: loop header
LB: loop body
LE: loop exit
PB: predicated region body
PF: predicated region fallthrough
CT: control target
= control target key end

     0   :  { %v1132_v1 = vmov 0   ;;  %s1416_s1 = inlined_call_operand.vmem [shape: bf16[128,128], index: 1, kind: input, shape index: {}, may-alias: {1,2}]   ;;  %s1417_s0 = inlined_call_operand.vmem [shape: bf16[128,128], index: 0, kind: input, shape index: {}]   ;;  %s1418_s3 = inlined_call_operand.vmem [shape: f32[128,1], index: 3, kind: input, shape index: {}]   ;;  %s1419_s5 = inlined_call_operand.vmem [shape: bf16[128,128], index: 5, kind: input, shape index: {}]   ;;  %s1420_s4 = inlined_call_operand.vmem [shape: bf16[128,128], index: 4, kind: input, shape index: {}]   ;;  %s1421_s2 = inlined_call_operand.vmem [shape: bf16[128,128], index: 2, kind: input, shape index: {}, may-alias: {1,2}]   ;;  %s1422_s6 = inlined_call_operand.vmem [shape: f32[1,128], index: 6, kind: input, shape index: {}]   ;;  %s1423_s7 = inlined_call_operand.vmem [shape: f32[128,128], index: 7, kind: output, shape index: {}]  }
   0x1   :  { %v1092_v0 = vld [vmem:[%s1416_s1 + $0x38] sm:$0xff]   ;;  %1091 = vset.pattern.permute.xlu1 %v1132_v1  ;;  %1090 = vset.pattern.permute.xlu0 %v1132_v1  ;;  %v1093_v2 = vld [vmem:[%s1416_s1 + $0x30] sm:$0xff]   ;;  %v1094_v3 = vld [vmem:[%s1416_s1 + $0x28] sm:$0xff]  }
   0x2   :  { %977 = vmatprep.subr.bf16.mxu0 %v1092_v0  ;;  %v1095_v4 = vld [vmem:[%s1416_s1 + $0x20] sm:$0xff]   ;;  %v1096_v6 = vld [vmem:[%s1416_s1 + $0x18] sm:$0xff]   ;;  %v1097_v7 = vld [vmem:[%s1416_s1 + $0x10] sm:$0xff]  }
   0x3   :  { %978 = vmatpush3.bf16.msra.mxu0 %v1092_v0  ;;  %v1100_v5 = vld [vmem:[%s1417_s0] sm:$0xff]   ;;  %v348_v10 = vld [vmem:[%s1418_s3 + $0x48] sm:$0xff]  ;;  %v342_v13 = vld [vmem:[%s1418_s3 + $0x18] sm:$0xff] }
   0x4   :  { %979 = vmatprep.subr.bf16.mxu0 %v1093_v2  ;;  %993 = vmatprep.mubr.bf16.mxu0 %v1100_v5  ;;  %v347_v8 = vld [vmem:[%s1418_s3 + $0x40] sm:$0xff]  ;;  %v340_v11 = vld [vmem:[%s1418_s3 + $0x8] sm:$0xff]  ;;  %v341_v14 = vld [vmem:[%s1418_s3 + $0x10] sm:$0xff] }
   0x5   :  { %v339_v9 = vld [vmem:[%s1418_s3] sm:$0xff]  ;;  %397 = vperm.xlu1 %1091, %v347_v8   ;;  %v1098_v12 = vld [vmem:[%s1416_s1 + $0x8] sm:$0xff]   ;;  %v1108_v15 = vld [vmem:[%s1419_s5 + $0x38] sm:$0xff]  }
   0x6   :  { %357 = vperm.xlu0 %1090, %v339_v9   ;;  %v1109_v16 = vld [vmem:[%s1419_s5 + $0x30] sm:$0xff]   ;;  %v1099_v17 = vld [vmem:[%s1416_s1] sm:$0xff]   ;;  %1009 = vmatprep.subr.bf16.mxu1 %v1108_v15  ;;  %v350_v18 = vld [vmem:[%s1418_s3 + $0x58] sm:$0xff] }
   0x7   :  { %980 = vmatpush3.bf16.msra.mxu0 %v1093_v2  ;;  %v349_v19 = vld [vmem:[%s1418_s3 + $0x50] sm:$0xff]  ;;  %1010 = vmatpush3.bf16.msra.mxu1 %v1108_v15  ;;  %v1110_v20 = vld [vmem:[%s1419_s5 + $0x28] sm:$0xff]   ;;  %v1239_v22 = vld [vmem:[%s1420_s4 + $0x38] sm:$0xff]  }
   0x8   :  { %981 = vmatprep.subr.bf16.mxu0 %v1094_v3  ;;  %1011 = vmatprep.subr.bf16.mxu1 %v1109_v16  ;;  %v1101_v21 = vld [vmem:[%s1417_s0 + $0x8] sm:$0xff]   ;;  %v1102_v23 = vld [vmem:[%s1417_s0 + $0x10] sm:$0xff]   ;;  %v343_v25 = vld [vmem:[%s1418_s3 + $0x20] sm:$0xff] }
   0x9   :  { %402 = vperm.xlu1 %1091, %v348_v10   ;;  %v344_v24 = vld [vmem:[%s1418_s3 + $0x28] sm:$0xff]  ;;  %v1111_v26 = vld [vmem:[%s1419_s5 + $0x20] sm:$0xff]   ;;  %v1116_v30 = vld [vmem:[%s1420_s4 + $0x30] sm:$0xff]  }
   0xa   :  { %362 = vperm.xlu0 %1090, %v340_v11   ;;  %v352_v27 = vld [vmem:[%s1418_s3 + $0x68] sm:$0xff]  ;;  %v351_v28 = vld [vmem:[%s1418_s3 + $0x60] sm:$0xff]  ;;  %v1112_v31 = vld [vmem:[%s1419_s5 + $0x18] sm:$0xff]  }
   0xb   :  { %982 = vmatpush3.bf16.msra.mxu0 %v1094_v3  ;;  %1012 = vmatpush3.bf16.msra.mxu1 %v1109_v16  ;;  %v1119_v29 = vld [vmem:[%s1421_s2] sm:$0xff]   ;;  %v1103_v32 = vld [vmem:[%s1417_s0 + $0x18] sm:$0xff]   ;;  %v345_v34 = vld [vmem:[%s1418_s3 + $0x30] sm:$0xff] }
   0xc   :  { %983 = vmatprep.subr.bf16.mxu0 %v1095_v4  ;;  %1013 = vmatprep.subr.bf16.mxu1 %v1110_v20  ;;  %v346_v33 = vld [vmem:[%s1418_s3 + $0x38] sm:$0xff]  ;;  %v1104_v35 = vld [vmem:[%s1417_s0 + $0x20] sm:$0xff]   ;;  %v1113_v36 = vld [vmem:[%s1419_s5 + $0x10] sm:$0xff]  }
   0xd   :  { %372 = vperm.xlu1 %1091, %v342_v13   ;;  %1025 = vmatprep.mubr.bf16.mxu1 %v1119_v29  ;;  %v1118_v37 = vld [vmem:[%s1420_s4 + $0x28] sm:$0xff]   ;;  %v354_v38 = vld [vmem:[%s1418_s3 + $0x78] sm:$0xff]  ;;  %v353_v39 = vld [vmem:[%s1418_s3 + $0x70] sm:$0xff] }
   0xe   :  { %367 = vperm.xlu0 %1090, %v341_v14   ;;  %v1115_v40 = vld [vmem:[%s1419_s5 + $0x8] sm:$0xff]   ;;  %v1121_v41 = vld [vmem:[%s1420_s4 + $0x20] sm:$0xff]   ;;  %v1106_v43 = vld [vmem:[%s1417_s0 + $0x30] sm:$0xff]  }
   0xf   :  { %984 = vmatpush3.bf16.msra.mxu0 %v1095_v4  ;;  %1014 = vmatpush3.bf16.msra.mxu1 %v1110_v20  ;;  %v1105_v42 = vld [vmem:[%s1417_s0 + $0x28] sm:$0xff]   ;;  %v1117_v44 = vld [vmem:[%s1419_s5] sm:$0xff]   ;;  %v1122_v45 = vld [vmem:[%s1420_s4 + $0x18] sm:$0xff]  }
  0x10   :  { %985 = vmatprep.subr.bf16.mxu0 %v1096_v6  ;;  %1015 = vmatprep.subr.bf16.mxu1 %v1111_v26  ;;  %v1120_v46 = vld [vmem:[%s1421_s2 + $0x8] sm:$0xff]   ;;  %v1107_v47 = vld [vmem:[%s1417_s0 + $0x38] sm:$0xff]   ;;  %v1123_v48 = vld [vmem:[%s1421_s2 + $0x10] sm:$0xff]  }
  0x11   :  { %412 = vperm.xlu1 %1091, %v350_v18   ;;  %v1124_v49 = vld [vmem:[%s1421_s2 + $0x18] sm:$0xff]   ;;  %v1125_v50 = vld [vmem:[%s1420_s4 + $0x10] sm:$0xff]   ;;  %v1126_v51 = vld [vmem:[%s1420_s4 + $0x8] sm:$0xff]  }
  0x12   :  { %407 = vperm.xlu0 %1090, %v349_v19   ;;  %v1127_v52 = vld [vmem:[%s1421_s2 + $0x20] sm:$0xff]   ;;  %v1128_v53 = vld [vmem:[%s1421_s2 + $0x28] sm:$0xff]   ;;  %v1130_v55 = vld [vmem:[%s1421_s2 + $0x30] sm:$0xff]  }
  0x13   :  { %986 = vmatpush3.bf16.msra.mxu0 %v1096_v6  ;;  %1016 = vmatpush3.bf16.msra.mxu1 %v1111_v26  ;;  %v1129_v54 = vld [vmem:[%s1420_s4] sm:$0xff]   ;;  %v1131_v56 = vld [vmem:[%s1421_s2 + $0x38] sm:$0xff]  }
  0x14   :  { %987 = vmatprep.subr.bf16.mxu0 %v1097_v7  ;;  %1017 = vmatprep.subr.bf16.mxu1 %v1112_v31 }
  0x15   :  { %382 = vperm.xlu1 %1091, %v344_v24  }
  0x16   :  { %377 = vperm.xlu0 %1090, %v343_v25  }
  0x17   :  { %988 = vmatpush3.bf16.msra.mxu0 %v1097_v7  ;;  %1018 = vmatpush3.bf16.msra.mxu1 %v1112_v31 }
  0x18   :  { %989 = vmatprep.subr.bf16.mxu0 %v1098_v12  ;;  %1019 = vmatprep.subr.bf16.mxu1 %v1113_v36 }
  0x19   :  { %422 = vperm.xlu1 %1091, %v352_v27  }
  0x1a   :  { %417 = vperm.xlu0 %1090, %v351_v28  }
  0x1b   :  { %990 = vmatpush3.bf16.msra.mxu0 %v1098_v12  ;;  %1020 = vmatpush3.bf16.msra.mxu1 %v1113_v36 }
  0x1c   :  { %991 = vmatprep.subr.bf16.mxu0 %v1099_v17  ;;  %1021 = vmatprep.subr.bf16.mxu1 %v1115_v40 }
  0x1d   :  { %392 = vperm.xlu1 %1091, %v346_v33  }
  0x1e   :  { %387 = vperm.xlu0 %1090, %v345_v34  }
  0x1f   :  { %992 = vmatpush3.bf16.msra.mxu0 %v1099_v17  ;;  %1022 = vmatpush3.bf16.msra.mxu1 %v1115_v40 }
  0x20   :  { %1041 = vmatprep.subr.bf16.mxu0 %v1239_v22  ;;  %1023 = vmatprep.subr.bf16.mxu1 %v1117_v44 }
  0x21   :  { %432 = vperm.xlu1 %1091, %v354_v38  }
  0x22   :  { %994 = vmatmul.mubr.bf16.vlgmr.msra.gmra.mxu0 %v1101_v21  ;;  %427 = vperm.xlu0 %1090, %v353_v39  }
  0x23   :  { %997 = vmatprep.mubr.bf16.mxu0 %v1102_v23  ;;  %1042 = vmatpush3.bf16.msra.mxu0 %v1239_v22 }
  0x24   :  { %1043 = vmatprep.subr.bf16.mxu0 %v1116_v30  ;;  %1024 = vmatpush3.bf16.msra.mxu1 %v1117_v44 }
  0x25   :  { %1073 = vmatprep.subr.bf16.mxu1 %v1239_v22 }
  0x27   :  { %1044 = vmatpush3.bf16.msra.mxu0 %v1116_v30  ;;  %1026 = vmatmul.mubr.bf16.vlgmr.msra.gmra.mxu1 %v1120_v46 }
  0x28   :  { %1045 = vmatprep.subr.bf16.mxu0 %v1118_v37  ;;  %1081 = vmatpush3.bf16.msra.mxu1 %v1239_v22 }
  0x29   :  { %1029 = vmatprep.mubr.bf16.mxu1 %v1123_v48  ;;  %1074 = vmatprep.subr.bf16.mxu1 %v1116_v30 }
  0x2a   :  { %998 = vmatmul.mubr.bf16.gmra.mxu0 %v1103_v32 }
  0x2b   :  { %1001 = vmatprep.mubr.bf16.mxu0 %v1104_v35  ;;  %1046 = vmatpush3.bf16.msra.mxu0 %v1118_v37 }
  0x2c   :  { %1047 = vmatprep.subr.bf16.mxu0 %v1121_v41  ;;  %1082 = vmatpush3.bf16.msra.mxu1 %v1116_v30 }
  0x2d   :  { %1075 = vmatprep.subr.bf16.mxu1 %v1118_v37 }
  0x2f   :  { %1048 = vmatpush3.bf16.msra.mxu0 %v1121_v41  ;;  %1030 = vmatmul.mubr.bf16.gmra.mxu1 %v1124_v49 }
  0x30   :  { %1049 = vmatprep.subr.bf16.mxu0 %v1122_v45  ;;  %1083 = vmatpush3.bf16.msra.mxu1 %v1118_v37 }
  0x31   :  { %1076 = vmatprep.subr.bf16.mxu1 %v1121_v41  ;;  %1033 = vmatprep.mubr.bf16.mxu1 %v1127_v52 }
  0x32   :  { %1002 = vmatmul.mubr.bf16.gmra.mxu0 %v1105_v42 }
  0x33   :  { %1005 = vmatprep.mubr.bf16.mxu0 %v1106_v43  ;;  %1050 = vmatpush3.bf16.msra.mxu0 %v1122_v45 }
  0x34   :  { %1084 = vmatpush3.bf16.msra.mxu1 %v1121_v41  ;;  %1051 = vmatprep.subr.bf16.mxu0 %v1125_v50 }
  0x35   :  { %1077 = vmatprep.subr.bf16.mxu1 %v1122_v45 }
  0x37   :  { %1052 = vmatpush3.bf16.msra.mxu0 %v1125_v50  ;;  %1034 = vmatmul.mubr.bf16.gmra.mxu1 %v1128_v53 }
  0x38   :  { %1085 = vmatpush3.bf16.msra.mxu1 %v1122_v45  ;;  %1053 = vmatprep.subr.bf16.mxu0 %v1126_v51 }
  0x39   :  { %1078 = vmatprep.subr.bf16.mxu1 %v1125_v50  ;;  %1037 = vmatprep.mubr.bf16.mxu1 %v1130_v55 }
  0x3a   :  { %1006 = vmatmul.mubr.bf16.gmra.mxu0 %v1107_v47 }
  0x3b   :  { %1054 = vmatpush3.bf16.msra.mxu0 %v1126_v51 }
  0x3c   :  { %1086 = vmatpush3.bf16.msra.mxu1 %v1125_v50  ;;  %1055 = vmatprep.subr.bf16.mxu0 %v1129_v54 }
  0x3d   :  { %1079 = vmatprep.subr.bf16.mxu1 %v1126_v51 }
  0x3f   :  { %1056 = vmatpush3.bf16.msra.mxu0 %v1129_v54  ;;  %1038 = vmatmul.mubr.bf16.gmra.mxu1 %v1131_v56 }
  0x40   :  { %1087 = vmatpush3.bf16.msra.mxu1 %v1126_v51 }
  0x41   :  { %1080 = vmatprep.subr.bf16.mxu1 %v1129_v54 }
  0x44   :  { %1088 = vmatpush3.bf16.msra.mxu1 %v1129_v54 }
  0x80   :  { %v398_v57 = vpop.permute.xlu1 %397 }
  0x81   :  { %v358_v58 = vpop.permute.xlu0 %357 }
  0x84   :  { %v403_v59 = vpop.permute.xlu1 %402 }
  0x85   :  { %v363_v60 = vpop.permute.xlu0 %362 }
  0x88   :  { %v373_v61 = vpop.permute.xlu1 %372 }
  0x89   :  { %v368_v62 = vpop.permute.xlu0 %367 }
  0x8c   :  { %v413_v63 = vpop.permute.xlu1 %412 }
  0x8d   :  { %v408_v0 = vpop.permute.xlu0 %407 }
  0x90   :  { %v383_v2 = vpop.permute.xlu1 %382 }
  0x91   :  { %v378_v4 = vpop.permute.xlu0 %377 }
  0x94   :  { %v423_v8 = vpop.permute.xlu1 %422 }
  0x95   :  { %v418_v13 = vpop.permute.xlu0 %417 }
  0x98   :  { %v393_v18 = vpop.permute.xlu1 %392 }
  0x99   :  { %v388_v21 = vpop.permute.xlu0 %387 }
  0x9c   :  { %v433_v40 = vpop.permute.xlu1 %432 }
  0x9d   :  { %v428_v43 = vpop.permute.xlu0 %427 }
  0xe2   :  { %v995_v1 = vpop.f32.mrf.mxu0 }
  0xe3   :  { %v437_v11 = vmul.f32 %v995_v1, %v368_v62  ;;  %v1350_v62 = vld [vmem:[%s1422_s6] ss:$0 sm:$0xff] }
  0xe4   :  { %v225_v3 = vpop.f32.mrf.mxu0 }
  0xe5   :  { %v435_v9 = vmul.f32 %v358_v58, %v225_v3 }
  0xe6   :  { %v996_v5 = vpop.f32.mrf.mxu0 }
  0xe7   :  { %v438_v6 = vmul.f32 %v996_v5, %v373_v61  ;;  %v1027_v49 = vpop.f32.mrf.mxu1 }
  0xe8   :  { %v228_v7 = vpop.f32.mrf.mxu0 }
  0xe9   :  { %v436_v10 = vmul.f32 %v363_v60, %v228_v7  ;;  %v452_v15 = vpack.c.bf16 %v438_v6, %v437_v11  ;;  %v637_v50 = vpop.f32.mrf.mxu1 }
  0xea   :  { %v999_v12 = vpop.f32.mrf.mxu0 }
  0xeb   :  { %v451_v14 = vpack.c.bf16 %v436_v10, %v435_v9  ;;  %v441_v24 = vmul.f32 %v999_v12, %v388_v21  ;;  %v1028_v51 = vpop.f32.mrf.mxu1 }
  0xec   :  { %v241_v16 = vpop.f32.mrf.mxu0 }
  0xed   :  { %1057 = vmatprep.mubr.bf16.mxu0 %v451_v14  ;;  %v439_v22 = vmul.f32 %v378_v4, %v241_v16  ;;  %v640_v52 = vpop.f32.mrf.mxu1 }
  0xee   :  { %v1000_v17 = vpop.f32.mrf.mxu0  ;;  %1058 = vmatmul.mubr.bf16.vlgmr.msra.gmra.mxu0 %v452_v15 }
  0xef   :  { %v442_v19 = vmul.f32 %v1000_v17, %v393_v18  ;;  %v1031_v53 = vpop.f32.mrf.mxu1 }
  0xf0   :  { %v244_v20 = vpop.f32.mrf.mxu0 }
  0xf1   :  { %v440_v23 = vmul.f32 %v383_v2, %v244_v20  ;;  %v454_v27 = vpack.c.bf16 %v442_v19, %v441_v24  ;;  %v653_v54 = vpop.f32.mrf.mxu1 }
  0xf2   :  { %v1003_v25 = vpop.f32.mrf.mxu0 }
  0xf3   :  { %v453_v26 = vpack.c.bf16 %v440_v23, %v439_v22  ;;  %v445_v34 = vmul.f32 %v1003_v25, %v408_v0  ;;  %v1032_v55 = vpop.f32.mrf.mxu1 }
  0xf4   :  { %v257_v28 = vpop.f32.mrf.mxu0 }
  0xf5   :  { %1061 = vmatprep.mubr.bf16.mxu0 %v453_v26  ;;  %v443_v32 = vmul.f32 %v398_v57, %v257_v28  ;;  %v656_v56 = vpop.f32.mrf.mxu1 }
  0xf6   :  { %v1004_v29 = vpop.f32.mrf.mxu0  ;;  %1062 = vmatmul.mubr.bf16.gmra.mxu0 %v454_v27 }
  0xf7   :  { %v446_v30 = vmul.f32 %v1004_v29, %v413_v63  ;;  %v1035_v57 = vpop.f32.mrf.mxu1 }
  0xf8   :  { %v260_v31 = vpop.f32.mrf.mxu0 }
  0xf9   :  { %v444_v33 = vmul.f32 %v403_v59, %v260_v31  ;;  %v456_v37 = vpack.c.bf16 %v446_v30, %v445_v34  ;;  %v669_v58 = vpop.f32.mrf.mxu1 }
  0xfa   :  { %v1007_v35 = vpop.f32.mrf.mxu0 }
  0xfb   :  { %v455_v36 = vpack.c.bf16 %v444_v33, %v443_v32  ;;  %v449_v46 = vmul.f32 %v1007_v35, %v428_v43  ;;  %v1036_v59 = vpop.f32.mrf.mxu1 }
  0xfc   :  { %v273_v38 = vpop.f32.mrf.mxu0 }
  0xfd   :  { %1065 = vmatprep.mubr.bf16.mxu1 %v455_v36  ;;  %v447_v44 = vmul.f32 %v418_v13, %v273_v38  ;;  %v672_v60 = vpop.f32.mrf.mxu1 }
  0xfe   :  { %v1008_v39 = vpop.f32.mrf.mxu0  ;;  %1066 = vmatmul.mubr.bf16.vlgmr.msra.gmra.mxu1 %v456_v37 }
  0xff   :  { %v450_v41 = vmul.f32 %v1008_v39, %v433_v40  ;;  %v1039_v0 = vpop.f32.mrf.mxu1 }
 0x100   :  { %v276_v42 = vpop.f32.mrf.mxu0 }
 0x101   :  { %v448_v45 = vmul.f32 %v423_v8, %v276_v42  ;;  %v458_v48 = vpack.c.bf16 %v450_v41, %v449_v46  ;;  %v685_v7 = vpop.f32.mrf.mxu1 }
 0x103   :  { %v457_v47 = vpack.c.bf16 %v448_v45, %v447_v44  ;;  %v1040_v14 = vpop.f32.mrf.mxu1 }
 0x105   :  { %1069 = vmatprep.mubr.bf16.mxu1 %v457_v47  ;;  %v688_v21 = vpop.f32.mrf.mxu1 }
 0x106   :  { %1070 = vmatmul.mubr.bf16.gmra.mxu1 %v458_v48 }
 0x1ae   :  { %v1059_v61 = vpop.f32.mrf.mxu0 }
 0x1af   :  { %v791_v63 = vadd.f32 %v1059_v61, %v1027_v49 }
 0x1b0   :  { %v782_v1 = vpop.f32.mrf.mxu0 }
 0x1b1   :  { %v854_v2 = vadd.f32 %v1350_v62, %v791_v63  ;;  %v783_v3 = vadd.f32 %v782_v1, %v637_v50 }
 0x1b2   :  { %v1060_v4 = vpop.f32.mrf.mxu0 }
 0x1b3   :  { %870 = vst [vmem:[%s1423_s7 + $0x10] sm:$0xff] %v854_v2  ;;  %v852_v5 = vadd.f32 %v1350_v62, %v783_v3  ;;  %v794_v6 = vadd.f32 %v1060_v4, %v1028_v51 }
 0x1b4   :  { %v785_v8 = vpop.f32.mrf.mxu0 }
 0x1b5   :  { %868 = vst [vmem:[%s1423_s7] sm:$0xff] %v852_v5  ;;  %v855_v9 = vadd.f32 %v1350_v62, %v794_v6  ;;  %v786_v10 = vadd.f32 %v785_v8, %v640_v52 }
 0x1b6   :  { %v1063_v11 = vpop.f32.mrf.mxu0 }
 0x1b7   :  { %871 = vst [vmem:[%s1423_s7 + $0x18] sm:$0xff] %v855_v9  ;;  %v853_v12 = vadd.f32 %v1350_v62, %v786_v10  ;;  %v807_v13 = vadd.f32 %v1063_v11, %v1031_v53 }
 0x1b8   :  { %v798_v15 = vpop.f32.mrf.mxu0 }
 0x1b9   :  { %869 = vst [vmem:[%s1423_s7 + $0x8] sm:$0xff] %v853_v12  ;;  %v858_v16 = vadd.f32 %v1350_v62, %v807_v13  ;;  %v799_v17 = vadd.f32 %v798_v15, %v653_v54 }
 0x1ba   :  { %v1064_v18 = vpop.f32.mrf.mxu0 }
 0x1bb   :  { %874 = vst [vmem:[%s1423_s7 + $0x30] sm:$0xff] %v858_v16  ;;  %v856_v19 = vadd.f32 %v1350_v62, %v799_v17  ;;  %v810_v20 = vadd.f32 %v1064_v18, %v1032_v55 }
 0x1bc   :  { %v801_v22 = vpop.f32.mrf.mxu0 }
 0x1bd   :  { %872 = vst [vmem:[%s1423_s7 + $0x20] sm:$0xff] %v856_v19  ;;  %v859_v23 = vadd.f32 %v1350_v62, %v810_v20  ;;  %v802_v24 = vadd.f32 %v801_v22, %v656_v56 }
 0x1be   :  { %v1067_v25 = vpop.f32.mrf.mxu1 }
 0x1bf   :  { %875 = vst [vmem:[%s1423_s7 + $0x38] sm:$0xff] %v859_v23  ;;  %v857_v26 = vadd.f32 %v1350_v62, %v802_v24  ;;  %v823_v27 = vadd.f32 %v1067_v25, %v1035_v57 }
 0x1c0   :  { %v814_v28 = vpop.f32.mrf.mxu1 }
 0x1c1   :  { %873 = vst [vmem:[%s1423_s7 + $0x28] sm:$0xff] %v857_v26  ;;  %v862_v29 = vadd.f32 %v1350_v62, %v823_v27  ;;  %v815_v30 = vadd.f32 %v814_v28, %v669_v58 }
 0x1c2   :  { %v1068_v31 = vpop.f32.mrf.mxu1 }
 0x1c3   :  { %878 = vst [vmem:[%s1423_s7 + $0x50] sm:$0xff] %v862_v29  ;;  %v860_v32 = vadd.f32 %v1350_v62, %v815_v30  ;;  %v826_v33 = vadd.f32 %v1068_v31, %v1036_v59 }
 0x1c4   :  { %v817_v34 = vpop.f32.mrf.mxu1 }
 0x1c5   :  { %876 = vst [vmem:[%s1423_s7 + $0x40] sm:$0xff] %v860_v32  ;;  %v863_v35 = vadd.f32 %v1350_v62, %v826_v33  ;;  %v818_v36 = vadd.f32 %v817_v34, %v672_v60 }
 0x1c6   :  { %v1071_v37 = vpop.f32.mrf.mxu1 }
 0x1c7   :  { %879 = vst [vmem:[%s1423_s7 + $0x58] sm:$0xff] %v863_v35  ;;  %v861_v38 = vadd.f32 %v1350_v62, %v818_v36  ;;  %v839_v39 = vadd.f32 %v1071_v37, %v1039_v0 }
 0x1c8   :  { %v830_v40 = vpop.f32.mrf.mxu1 }
 0x1c9   :  { %877 = vst [vmem:[%s1423_s7 + $0x48] sm:$0xff] %v861_v38  ;;  %v866_v41 = vadd.f32 %v1350_v62, %v839_v39  ;;  %v831_v42 = vadd.f32 %v830_v40, %v685_v7 }
 0x1ca   :  { %v1072_v43 = vpop.f32.mrf.mxu1 }
 0x1cb   :  { %882 = vst [vmem:[%s1423_s7 + $0x70] sm:$0xff] %v866_v41  ;;  %v864_v44 = vadd.f32 %v1350_v62, %v831_v42  ;;  %v842_v45 = vadd.f32 %v1072_v43, %v1040_v14 }
 0x1cc   :  { %v833_v46 = vpop.f32.mrf.mxu1 }
 0x1cd   :  { %880 = vst [vmem:[%s1423_s7 + $0x60] sm:$0xff] %v864_v44  ;;  %v867_v47 = vadd.f32 %v1350_v62, %v842_v45  ;;  %v834_v48 = vadd.f32 %v833_v46, %v688_v21 }
 0x1cf   :  { %883 = vst [vmem:[%s1423_s7 + $0x78] sm:$0xff] %v867_v47  ;;  %v865_v49 = vadd.f32 %v1350_v62, %v834_v48 }
 0x1d1   :  { %881 = vst [vmem:[%s1423_s7 + $0x68] sm:$0xff] %v865_v49 }

</bundles_post_ra>
